<compile_context>
chip_gen: v5e
topology: v5e:2x2
jax: 0.10.0
libtpu: 0.0.40
codegen_flags: <defaults>
</compile_context>

<pallas_src>
import jax
import jax.numpy as jnp
from jax.experimental import pallas as pl
from jax.experimental.pallas import tpu as pltpu


def _softmax2d_kernel(x_ref, o_ref):
    # x_ref / o_ref: (TILE_R, H*W) block in VMEM; each row is one (n, c) plane.
    ex = jnp.exp(x_ref[...].astype(jnp.float32))
    denom = jnp.sum(ex, axis=-1, keepdims=True)  # per-row, lane-axis reduce
    # exact reciprocal keeps the 1e-6 tolerance vs. the JAX reference
    o_ref[...] = (ex * pl.reciprocal(denom, approx=False)).astype(o_ref.dtype)


def _pick_tile_rows(rows, cols, itemsize, max_block_bytes):
    """Largest row tile that divides `rows`, respects the (8,128) sublane rule
    (multiple of 8 or the full extent), and fits the per-block byte budget."""
    if rows * cols * itemsize <= max_block_bytes:
        return rows
    best = None
    d = 8
    while d <= rows:
        if rows % d == 0 and d * cols * itemsize <= max_block_bytes:
            best = d
        d += 8
    # Fallback: take the whole thing (correctness over peak perf).
    return best if best is not None else rows


def softmax_legit_2d(x, *, max_block_bytes=4 * 1024 * 1024):
    """exp(x) / sum(exp(x), dims=(2,3), keepdims) for NCHW input."""
    N, C, H, W = x.shape
    rows, cols = N * C, H * W
    xf = x.reshape(rows, cols)

    # Budget accounts for the f32 working copy inside the kernel; with default
    # double buffering (2x in + 2x out) total VMEM stays well under the v7x
    # 32 MiB default scoped limit for a 4 MiB block.
    itemsize = max(jnp.dtype(x.dtype).itemsize, 4)
    tile_r = _pick_tile_rows(rows, cols, itemsize, max_block_bytes)
    grid_r = rows // tile_r

    out_flat = pl.pallas_call(
        _softmax2d_kernel,
        out_shape=jax.ShapeDtypeStruct((rows, cols), x.dtype),
        grid_spec=pltpu.PrefetchScalarGridSpec(
            num_scalar_prefetch=0,
            grid=(grid_r,),
            in_specs=[pl.BlockSpec((tile_r, cols), lambda r: (r, 0))],
            out_specs=pl.BlockSpec((tile_r, cols), lambda r: (r, 0)),
        ),
        compiler_params=pltpu.CompilerParams(
            dimension_semantics=("parallel",),
        ),
    )(xf)

    return out_flat.reshape(N, C, H, W)


def _reference(x):
    ex = jnp.exp(x)
    return ex / jnp.sum(ex, axis=(2, 3), keepdims=True)


if __name__ == "__main__":
    key = jax.random.PRNGKey(0)
    x = jax.random.normal(key, (2, 4, 16, 16), dtype=jnp.float32)

    out = softmax_legit_2d(x)
    jax.block_until_ready(out)

    ref = _reference(x)
    assert out.shape == ref.shape
    assert jnp.allclose(out, ref, atol=1e-6, rtol=1e-6), "mismatch vs reference"
    print("KERNEL_OK")
</pallas_src>

<mosaic_0001>
module attributes {stable_mosaic.version = 11 : i64} {
  func.func @_softmax2d_kernel(%arg0: i32, %arg1: memref<8x256xf32, #tpu.memory_space<vmem>>, %arg2: memref<8x256xf32, #tpu.memory_space<vmem>>) attributes {dimension_semantics = [#tpu.dimension_semantics<parallel>], iteration_bounds = array<i64: 1>, scalar_prefetch = 0 : i64, scratch_operands = 0 : i64, tpu.core_type = #tpu.core_type<tc>, window_params = [{transform_indices = @transform_0, window_bounds = array<i64: 8, 256>}, {transform_indices = @transform_1, window_bounds = array<i64: 8, 256>}]} {
    %c0 = arith.constant 0 : index
    %c0_0 = arith.constant 0 : index
    %0 = vector.load %arg1[%c0, %c0_0] : memref<8x256xf32, #tpu.memory_space<vmem>>, vector<8x256xf32>
    %1 = math.exp %0 : vector<8x256xf32>
    %cst = arith.constant dense<0.000000e+00> : vector<8xf32>
    %2 = vector.multi_reduction <add>, %1, %cst [1] : vector<8x256xf32> to vector<8xf32>
    %3 = vector.shape_cast %2 : vector<8xf32> to vector<8x1xf32>
    %4 = tpu.reciprocal %3 : vector<8x1xf32> -> vector<8x1xf32>
    %5 = vector.broadcast %4 : vector<8x1xf32> to vector<8x256xf32>
    %6 = arith.mulf %1, %5 : vector<8x256xf32>
    %c0_1 = arith.constant 0 : index
    %c0_2 = arith.constant 0 : index
    %7 = vector.load %arg2[%c0_1, %c0_2] : memref<8x256xf32, #tpu.memory_space<vmem>>, vector<8x256xf32>
    tpu.vector_store %arg2[%c0_1, %c0_2], %6 {strides = array<i32>} : memref<8x256xf32, #tpu.memory_space<vmem>>, vector<8x256xf32>,
    return
  }
  func.func @transform_0(%arg0: i32) -> (i32, i32) {
    %c0_i32 = arith.constant 0 : i32
    %c0_i32_0 = arith.constant 0 : i32
    return %arg0, %c0_i32 : i32, i32
  }
  func.func @transform_1(%arg0: i32) -> (i32, i32) {
    %c0_i32 = arith.constant 0 : i32
    %c0_i32_0 = arith.constant 0 : i32
    return %arg0, %c0_i32 : i32, i32
  }
}

</mosaic_0001>

<bundles_post_ra>
// kernel: tpu_custom_call.1
= control target key start
LH: loop header
LB: loop body
LE: loop exit
PB: predicated region body
PF: predicated region fallthrough
CT: control target
= control target key end

     0   :  { %6 = vsyncpa [#allocation3], 0  ;;  %s145_s0 = inlined_call_operand.hbm [shape: f32[8,256], index: 0, kind: input, shape index: {}]   ;;  %s146_s1 = inlined_call_operand.hbm [shape: f32[8,256], index: 1, kind: output, shape index: {}]  }
   0x1   :  { %7 = vsyncpa [#allocation4], 0  ;;  %s13_s8 = sshll.u32 %s145_s0, 4  ;;  %s127_s9 = smov [#allocation2]   ;;  %s14_s8 = int_to_ptr.hbm [resolvable:$true] %s13_s8 }
   0x2   :  { %s15_s10 = sshll.u32 %s127_s9, 4  ;;  %s16_s10 = int_to_ptr.vmem [resolvable:$true] %s15_s10 }
   0x3   :  { %18 = dma.hbm_to_vmem [thread:$0]  %s14_s8, 256, %s16_s10, [#allocation3]  }
   0x4   :  { %123 = dma.done.wait [#allocation3], 256  }
   0x5   :  { %124 = vsyncadd [#allocation3], 4294967040  ;;  %v23_v0 = vld [vmem:[#allocation2] sm:$0xff]  ;;  %v24_v1 = vld [vmem:[#allocation2 + $0x8] sm:$0xff]  ;;  %s128_s0 = smov [#allocation5]   ;;  %s57_s14 = sshll.u32 %s146_s1, 4  ;;  %s58_s14 = int_to_ptr.hbm [resolvable:$true] %s57_s14 }
   0x6   :  { %v25_v2 = vmul.f32 1.442695, %v23_v0  ;;  %v27_v3 = vmul.f32 1.442695, %v24_v1  ;;  %s55_s11 = sshll.u32 %s128_s0, 4  ;;  %s56_s11 = int_to_ptr.vmem [resolvable:$true] %s55_s11 }
   0x8   :  { %69 = vpow2.f32 %v25_v2 }
   0x9   :  { %71 = vpow2.f32 %v27_v3 }
   0xe   :  { %v70_v4 = vpop.eup %69 }
   0xf   :  { %v72_v5 = vpop.eup %71 }
  0x10   :  { %v29_v6 = vadd.f32 %v72_v5, %v70_v4 }
  0x12   :  { %30 = vadd.xlane.f32.xlu0 %v29_v6 }
  0x85   :  { %v31_v7 = vpop.xlane.xlu0 %30 }
  0x86   :  { %73 = vrcp.f32 %v31_v7  ;;  %v43_v11 = vand.u32 2147483648, %v31_v7  ;;  %v41_v13 = vand.u32 2147483647, %v31_v7  ;;  %vm37_vm1 = vweird.f32 %v31_v7 }
  0x88   :  { %v44_v15 = vor.u32 1.1754944e-38, %v43_v11  ;;  %vm42_vm3 = vcmp.eq.f32.partialorder %v41_v13, 8.507059e+37 }
  0x8c   :  { %v74_v8 = vpop.eup %73 }
  0x8d   :  { %v33_v9 = vmul.f32 %v74_v8, %v31_v7  ;;  %vm38_vm0 = vweird.f32 %v74_v8 }
  0x8e   :  { %vm39_vm2 = vmor %vm37_vm1, %vm38_vm0 }
  0x8f   :  { %v34_v10 = vsub.f32 1.0, %v33_v9 }
  0x91   :  { %v35_v12 = vmul.f32 %v74_v8, %v34_v10 }
  0x93   :  { %v36_v14 = vadd.f32 %v74_v8, %v35_v12 }
  0x95   :  { %v40_v16 = vsel %vm39_vm2, %v74_v8, %v36_v14 }
  0x96   :  { %v45_v17 = vsel %vm42_vm3, %v44_v15, %v40_v16 }
  0x97   :  { %v46_v18 = vmul.f32 %v70_v4, %v45_v17  ;;  %v47_v19 = vmul.f32 %v72_v5, %v45_v17 }
  0x99   :  { %48 = vst [vmem:[#allocation5] sm:$0xff] %v46_v18 }
  0x9a   :  { %49 = vst [vmem:[#allocation5 + $0x8] sm:$0xff] %v47_v19 }
  0x9b   :  { %60 = dma.vmem_to_hbm [thread:$0]  %s56_s11, 256, %s58_s14, [#allocation4]  }
  0x9c   :  { %125 = dma.done.wait [#allocation4], 256  }
  0x9d   :  { %126 = vsyncadd [#allocation4], 4294967040 }
  0x9e   :  { %65 = vsyncpa [#allocation3], 1 }
  0x9f   :  { %66 = vsyncpa [#allocation4], 1 }

</bundles_post_ra>
